<compile_context>
chip_gen: v6e
topology: v6e:2x2x1
jax: 0.10.0
libtpu: 0.0.40
codegen_flags: <defaults>
</compile_context>

<pallas_src>
import jax
import jax.numpy as jnp
from jax.experimental import pallas as pl
from jax.experimental.pallas import tpu as pltpu


# ---------------------------------------------------------------------------
# Helpers: VMEM budget + budget-aware tiling.
# ---------------------------------------------------------------------------
def _round_up(x, m):
    return (x + m - 1) // m * m


def _vmem_limit_bytes():
    """~75% of physical per-core VMEM: ~96 MiB on v5e/v6e (128 MiB), ~48 MiB on v7x (64 MiB)."""
    try:
        cap = int(pltpu.get_tpu_info().vmem_capacity_bytes)
    except Exception:
        cap = 64 * 1024 * 1024  # conservative default if the query fails
    return max(16 * 1024 * 1024, (cap * 3) // 4)


def _choose_tiles(batch, cinp, coutp, mtot, in_itemsize, vmem_limit):
    """Pick (co_tile, m_tile) such that:
       * double-buffered per-step blocks fit in ~50% of the scoped VMEM limit,
       * the two f32 accumulators (2 * co_tile * m_tile * 4B) stay <= 128 KiB
         so they remain vreg-resident (64 x 4 KiB vreg file),
       * prefer the largest lane (m) tile first, then the largest Cout tile,
       * keep >= 2 total grid steps so the v7x megacore has work to split.
    """
    budget = vmem_limit // 2
    acc_cap_elems = (128 * 1024) // 8                 # co_tile * m_tile <= 16384
    m_cands = [m for m in range(128, mtot + 1, 128) if mtot % m == 0]
    co_cands = [c for c in range(8, coutp + 1, 8) if coutp % c == 0]
    co_tile, m_tile = co_cands[0], m_cands[0]         # minimal fallback
    done = False
    for m in sorted(m_cands, reverse=True):
        for c in sorted(co_cands, reverse=True):
            if c * m > acc_cap_elems:
                continue
            foot = 2 * (2 * batch * cinp * m * in_itemsize     # x block (re/im), x2 dbl-buffer
                        + 2 * cinp * c * m * in_itemsize       # w block (re/im)
                        + 2 * batch * c * m * 4)               # f32 out block (re/im)
            if foot <= budget:
                co_tile, m_tile = c, m
                done = True
                break
        if done:
            break
    # Keep at least 2 grid steps (megacore split on v7x; ~free on v5e/v6e).
    if (mtot // m_tile) * (coutp // co_tile) < 2:
        smaller = [m for m in m_cands if m < m_tile]
        if smaller:
            m_tile = max(smaller)
    return co_tile, m_tile


# ---------------------------------------------------------------------------
# Pallas kernel: complex channel mixing on one (m-tile, Cout-tile) block.
# ---------------------------------------------------------------------------
def _make_mix_kernel(batch, cin, static_unroll_limit=8, fori_unroll=4):
    """Kernel body.  Refs:
         x_ref: [2, B,    CinP, Mt]   (real/imag, batch, in-ch,  modes)
         w_ref: [2, CinP, CoT,  Mt]
         o_ref: [2, B,    CoT,  Mt]   (f32)
       `cin` is the *unpadded* Cin — padded zero rows are simply skipped.
    """

    def kernel(x_ref, w_ref, o_ref):
        cot, mt = o_ref.shape[2], o_ref.shape[3]

        def load(part, b, i):
            # x row is a single replicated [1, Mt] row (broadcast over sublanes in
            # the multiply); w tile is loaded directly as [CoT, Mt] — no broadcast.
            xv = x_ref[part, b, pl.ds(i, 1), :].astype(jnp.float32)         # [1, Mt]
            wv = w_ref[part, pl.ds(i, 1), :, :][0].astype(jnp.float32)      # [CoT, Mt]
            return xv, wv

        for b in range(batch):                      # B is small; per-batch accumulators
            if cin <= static_unroll_limit:
                acc_r = jnp.zeros((cot, mt), jnp.float32)
                acc_i = jnp.zeros((cot, mt), jnp.float32)
                for i in range(cin):
                    xr, wr = load(0, b, i)
                    xi, wi = load(1, b, i)
                    acc_r = acc_r + (xr * wr - xi * wi)
                    acc_i = acc_i + (xi * wr + xr * wi)
            else:
                def body(i, carry):
                    ar, ai = carry
                    xr, wr = load(0, b, i)
                    xi, wi = load(1, b, i)
                    return (ar + (xr * wr - xi * wi),
                            ai + (xi * wr + xr * wi))

                acc_r, acc_i = jax.lax.fori_loop(
                    0, cin, body,
                    (jnp.zeros((cot, mt), jnp.float32),
                     jnp.zeros((cot, mt), jnp.float32)),
                    unroll=min(fori_unroll, cin))
            o_ref[0, b, :, :] = acc_r.astype(o_ref.dtype)
            o_ref[1, b, :, :] = acc_i.astype(o_ref.dtype)

    return kernel


def _spectral_mix(x_ri, w_ri, *, cin, co_tile, m_tile, vmem_limit_bytes):
    """x_ri: [2,B,CinP,Mtot]; w_ri: [2,CinP,CoutP,Mtot] -> [2,B,CoutP,Mtot] f32."""
    _, B, cinp, mtot = x_ri.shape
    coutp = w_ri.shape[2]
    n_m = mtot // m_tile
    n_co = coutp // co_tile

    kernel = _make_mix_kernel(batch=B, cin=cin)

    in_isz = jnp.dtype(x_ri.dtype).itemsize
    cost = pl.CostEstimate(
        flops=8 * B * cin * coutp * mtot,
        transcendentals=0,
        bytes_accessed=int(x_ri.size * in_isz
                           + w_ri.size * jnp.dtype(w_ri.dtype).itemsize
                           + 2 * B * coutp * mtot * 4),
    )

    return pl.pallas_call(
        kernel,
        out_shape=jax.ShapeDtypeStruct((2, B, coutp, mtot), jnp.float32),
        grid_spec=pltpu.PrefetchScalarGridSpec(
            num_scalar_prefetch=0,
            # Cout tile innermost: the x block index depends only on m, so x stays
            # resident across the whole Cout sweep; x, w and out are each DMA'd once.
            grid=(n_m, n_co),
            in_specs=[
                pl.BlockSpec((2, B, cinp, m_tile), lambda m, c: (0, 0, 0, m)),
                pl.BlockSpec((2, cinp, co_tile, m_tile), lambda m, c: (0, 0, c, m)),
            ],
            out_specs=pl.BlockSpec((2, B, co_tile, m_tile), lambda m, c: (0, 0, c, m)),
        ),
        compiler_params=pltpu.CompilerParams(
            dimension_semantics=("parallel", "parallel"),
            vmem_limit_bytes=vmem_limit_bytes,
        ),
        cost_estimate=cost,
    )(x_ri, w_ri)


# ---------------------------------------------------------------------------
# Module (forward only).
# ---------------------------------------------------------------------------
class SpectralConv3dUNO:
    """JAX/Pallas port of SpectralConv3d_UNO (forward only).

    `dtype` is the storage/compute dtype fed to the Pallas kernel (bf16 by
    default on every TPU generation — it halves the dominant weight/activation
    HBM traffic; accumulation is always f32). Pass dtype=jnp.float32 for tight
    parity checks.
    """

    def __init__(self, in_channels, out_channels, D1, D2, D3,
                 modes1=None, modes2=None, modes3=None, key=None,
                 dtype=jnp.bfloat16):
        self.in_channels = in_channels
        self.out_channels = out_channels
        self.d1, self.d2, self.d3 = D1, D2, D3
        if modes1 is not None:
            self.modes1, self.modes2, self.modes3 = modes1, modes2, modes3
        else:
            self.modes1, self.modes2, self.modes3 = D1, D2, D3 // 2 + 1
        self.scale = (1.0 / (2.0 * in_channels)) ** 0.5
        self.dtype = dtype

        if key is None:
            key = jax.random.PRNGKey(0)
        ks = jax.random.split(key, 4)
        wshape = (2, in_channels, out_channels, self.modes1, self.modes2, self.modes3)
        # deterministic init, matches torch.rand (uniform [0,1)) * scale; f32 masters.
        self.weights1 = self.scale * jax.random.uniform(ks[0], wshape, jnp.float32)
        self.weights2 = self.scale * jax.random.uniform(ks[1], wshape, jnp.float32)
        self.weights3 = self.scale * jax.random.uniform(ks[2], wshape, jnp.float32)
        self.weights4 = self.scale * jax.random.uniform(ks[3], wshape, jnp.float32)

        Cin, Cout = in_channels, out_channels
        M = self.modes1 * self.modes2 * self.modes3
        self._m_flat = M
        self._m_total = _round_up(4 * M, 128)      # 4 corners folded into the lane axis
        self._cin_p = _round_up(Cin, 8)            # sublane-dense channel dims
        self._cout_p = _round_up(Cout, 8)
        self._vmem_limit = _vmem_limit_bytes()

        # Pre-stack / fold corners / pad the weights ONCE (not per forward call).
        w_all = jnp.stack([self.weights1, self.weights2, self.weights3, self.weights4],
                          axis=0)                                  # [4,2,Cin,Cout,m1,m2,m3]
        w_ri = jnp.transpose(w_all, (1, 2, 3, 0, 4, 5, 6)).reshape(2, Cin, Cout, 4 * M)
        w_ri = jnp.pad(w_ri, ((0, 0),
                              (0, self._cin_p - Cin),
                              (0, self._cout_p - Cout),
                              (0, self._m_total - 4 * M)))
        self.w_ri = w_ri.astype(dtype)                             # [2,CinP,CoutP,Mtot]

    def __call__(self, x, D1=None, D2=None, D3=None):
        # Output dims come from the arguments (no self mutation -> jit/vmap safe).
        if D1 is not None:
            d1, d2, d3 = D1, D2, D3
        else:
            d1, d2, d3 = self.d1, self.d2, self.d3
        B = x.shape[0]
        m1, m2, m3 = self.modes1, self.modes2, self.modes3
        Cin, Cout = self.in_channels, self.out_channels
        M, Mtot = self._m_flat, self._m_total

        # TODO(synk): FFT / inverse FFT have no Pallas primitive — kept as plain JAX.
        x_ft = jnp.fft.rfftn(x, axes=(-3, -2, -1), norm="forward")  # [B,Cin,S1,S2,S3//2+1]

        # TODO(synk): the corner gather/scatter is XLA glue; it could be fused into
        # the Pallas call with pl.Element offsets for very large spectra.
        blocks = jnp.stack([
            x_ft[:, :, :m1, :m2, :m3],
            x_ft[:, :, -m1:, :m2, :m3],
            x_ft[:, :, :m1, -m2:, :m3],
            x_ft[:, :, -m1:, -m2:, :m3],
        ], axis=2)                                                   # [B,Cin,4,m1,m2,m3]
        blocks = blocks.reshape(B, Cin, 4 * M)                       # corners folded into lanes
        x_ri = jnp.stack([jnp.real(blocks), jnp.imag(blocks)], axis=0).astype(self.dtype)
        x_ri = jnp.pad(x_ri, ((0, 0), (0, 0),
                              (0, self._cin_p - Cin),
                              (0, Mtot - 4 * M)))                    # [2,B,CinP,Mtot]

        co_tile, m_tile = _choose_tiles(B, self._cin_p, self._cout_p, Mtot,
                                        jnp.dtype(self.dtype).itemsize, self._vmem_limit)
        out_ri = _spectral_mix(x_ri, self.w_ri, cin=Cin,
                               co_tile=co_tile, m_tile=m_tile,
                               vmem_limit_bytes=self._vmem_limit)    # [2,B,CoutP,Mtot] f32
        out_ri = out_ri[:, :, :Cout, :4 * M].reshape(2, B, Cout, 4, m1, m2, m3)
        out_c = (out_ri[0] + 1j * out_ri[1]).astype(jnp.complex64)   # [B,Cout,4,m1,m2,m3]

        # Sequential sets reproduce the PyTorch overwrite-on-overlap semantics.
        out_ft = jnp.zeros((B, Cout, d1, d2, d3 // 2 + 1), jnp.complex64)
        out_ft = out_ft.at[:, :, :m1, :m2, :m3].set(out_c[:, :, 0])
        out_ft = out_ft.at[:, :, -m1:, :m2, :m3].set(out_c[:, :, 1])
        out_ft = out_ft.at[:, :, :m1, -m2:, :m3].set(out_c[:, :, 2])
        out_ft = out_ft.at[:, :, -m1:, -m2:, :m3].set(out_c[:, :, 3])

        y = jnp.fft.irfftn(out_ft, s=(d1, d2, d3), axes=(-3, -2, -1), norm="forward")
        return y.astype(jnp.float32)


# ---------------------------------------------------------------------------
# Pure-JAX reference (for correctness checks).
# ---------------------------------------------------------------------------
def _reference_forward(layer, x):
    m1, m2, m3 = layer.modes1, layer.modes2, layer.modes3
    B = x.shape[0]
    x_ft = jnp.fft.rfftn(x, axes=(-3, -2, -1), norm="forward")

    def cm(inp, w):
        real = (jnp.einsum("bixyz,ioxyz->boxyz", jnp.real(inp), w[0])
                - jnp.einsum("bixyz,ioxyz->boxyz", jnp.imag(inp), w[1]))
        imag = (jnp.einsum("bixyz,ioxyz->boxyz", jnp.imag(inp), w[0])
                + jnp.einsum("bixyz,ioxyz->boxyz", jnp.real(inp), w[1]))
        return (real + 1j * imag).astype(jnp.complex64)

    out_ft = jnp.zeros((B, layer.out_channels, layer.d1, layer.d2, layer.d3 // 2 + 1),
                       jnp.complex64)
    out_ft = out_ft.at[:, :, :m1, :m2, :m3].set(cm(x_ft[:, :, :m1, :m2, :m3], layer.weights1))
    out_ft = out_ft.at[:, :, -m1:, :m2, :m3].set(cm(x_ft[:, :, -m1:, :m2, :m3], layer.weights2))
    out_ft = out_ft.at[:, :, :m1, -m2:, :m3].set(cm(x_ft[:, :, :m1, -m2:, :m3], layer.weights3))
    out_ft = out_ft.at[:, :, -m1:, -m2:, :m3].set(cm(x_ft[:, :, -m1:, -m2:, :m3], layer.weights4))
    y = jnp.fft.irfftn(out_ft, s=(layer.d1, layer.d2, layer.d3),
                       axes=(-3, -2, -1), norm="forward")
    return y.astype(jnp.float32)


if __name__ == "__main__":
    key = jax.random.PRNGKey(0)
    k_x1, k_w, k_x2 = jax.random.split(key, 3)

    # --- test 1: f32 storage, small channels (static-unroll path) -----------
    B, Cin, Cout = 2, 4, 4
    S1 = S2 = S3 = 16
    D1 = D2 = D3 = 16
    m1, m2, m3 = 6, 6, 5          # M=180 per corner -> 4*M=720 -> padded to 768 lanes

    x = jax.random.normal(k_x1, (B, Cin, S1, S2, S3), jnp.float32)
    layer_f32 = SpectralConv3dUNO(Cin, Cout, D1, D2, D3, m1, m2, m3,
                                  key=k_w, dtype=jnp.float32)
    y = jax.block_until_ready(layer_f32(x))
    assert y.shape == (B, Cout, D1, D2, D3), y.shape

    y_ref = _reference_forward(layer_f32, x)
    assert jnp.allclose(y, y_ref, atol=1e-4, rtol=1e-4), \
        float(jnp.max(jnp.abs(y - y_ref)))

    # --- same problem with the default bf16 storage (loose tolerance) --------
    layer_bf16 = SpectralConv3dUNO(Cin, Cout, D1, D2, D3, m1, m2, m3, key=k_w)
    y_bf = jax.block_until_ready(layer_bf16(x))
    err = float(jnp.max(jnp.abs(y_bf - y_ref)))
    scale = float(jnp.max(jnp.abs(y_ref)))
    assert err <= 0.05 * scale + 1e-6, (err, scale)

    # --- test 2: fori-loop path (Cin>8), odd Cout (sublane padding), D != S,
    #             called under jit to verify trace purity ---------------------
    B2, Cin2, Cout2 = 2, 16, 6
    s1, s2, s3 = 12, 12, 10
    d1b, d2b, d3b = 14, 12, 10
    mm1, mm2, mm3 = 4, 4, 3

    x2 = jax.random.normal(k_x2, (B2, Cin2, s1, s2, s3), jnp.float32)
    layer2 = SpectralConv3dUNO(Cin2, Cout2, d1b, d2b, d3b, mm1, mm2, mm3,
                               key=k_w, dtype=jnp.float32)
    y2 = jax.block_until_ready(jax.jit(layer2.__call__)(x2))
    assert y2.shape == (B2, Cout2, d1b, d2b, d3b), y2.shape
    y2_ref = _reference_forward(layer2, x2)
    assert jnp.allclose(y2, y2_ref, atol=1e-4, rtol=1e-4), \
        float(jnp.max(jnp.abs(y2 - y2_ref)))

    print("KERNEL_OK")
</pallas_src>

<mosaic_0001>
module attributes {stable_mosaic.version = 11 : i64} {
  func.func @kernel(%arg0: i32, %arg1: i32, %arg2: memref<2x2x8x384xf32, #tpu.memory_space<vmem>>, %arg3: memref<2x8x8x384xf32, #tpu.memory_space<vmem>>, %arg4: memref<2x2x8x384xf32, #tpu.memory_space<vmem>>) attributes {dimension_semantics = [#tpu.dimension_semantics<parallel>, #tpu.dimension_semantics<parallel>], iteration_bounds = array<i64: 2, 1>, scalar_prefetch = 0 : i64, scratch_operands = 0 : i64, tpu.core_type = #tpu.core_type<tc>, window_params = [{transform_indices = @transform_0, window_bounds = array<i64: 2, 2, 8, 384>}, {transform_indices = @transform_1, window_bounds = array<i64: 2, 8, 8, 384>}, {transform_indices = @transform_2, window_bounds = array<i64: 2, 2, 8, 384>}]} {
    %cst = arith.constant 0.000000e+00 : f32
    %0 = vector.broadcast %cst : f32 to vector<8x384xf32>
    %cst_0 = arith.constant 0.000000e+00 : f32
    %1 = vector.broadcast %cst_0 : f32 to vector<8x384xf32>
    %c0 = arith.constant 0 : index
    %c0_1 = arith.constant 0 : index
    %c0_2 = arith.constant 0 : index
    %c0_3 = arith.constant 0 : index
    %2 = vector.load %arg2[%c0, %c0_1, %c0_2, %c0_3] : memref<2x2x8x384xf32, #tpu.memory_space<vmem>>, vector<1x1x1x384xf32>
    %3 = vector.shape_cast %2 : vector<1x1x1x384xf32> to vector<1x384xf32>
    %c0_4 = arith.constant 0 : index
    %c0_5 = arith.constant 0 : index
    %c0_6 = arith.constant 0 : index
    %c0_7 = arith.constant 0 : index
    %4 = vector.load %arg3[%c0_4, %c0_5, %c0_6, %c0_7] : memref<2x8x8x384xf32, #tpu.memory_space<vmem>>, vector<1x1x8x384xf32>
    %5 = vector.shape_cast %4 : vector<1x1x8x384xf32> to vector<1x8x384xf32>
    %6 = vector.shape_cast %5 : vector<1x8x384xf32> to vector<8x384xf32>
    %c1 = arith.constant 1 : index
    %c0_8 = arith.constant 0 : index
    %c0_9 = arith.constant 0 : index
    %c0_10 = arith.constant 0 : index
    %7 = vector.load %arg2[%c1, %c0_8, %c0_9, %c0_10] : memref<2x2x8x384xf32, #tpu.memory_space<vmem>>, vector<1x1x1x384xf32>
    %8 = vector.shape_cast %7 : vector<1x1x1x384xf32> to vector<1x384xf32>
    %c1_11 = arith.constant 1 : index
    %c0_12 = arith.constant 0 : index
    %c0_13 = arith.constant 0 : index
    %c0_14 = arith.constant 0 : index
    %9 = vector.load %arg3[%c1_11, %c0_12, %c0_13, %c0_14] : memref<2x8x8x384xf32, #tpu.memory_space<vmem>>, vector<1x1x8x384xf32>
    %10 = vector.shape_cast %9 : vector<1x1x8x384xf32> to vector<1x8x384xf32>
    %11 = vector.shape_cast %10 : vector<1x8x384xf32> to vector<8x384xf32>
    %12 = vector.broadcast %3 : vector<1x384xf32> to vector<8x384xf32>
    %13 = arith.mulf %12, %6 : vector<8x384xf32>
    %14 = vector.broadcast %8 : vector<1x384xf32> to vector<8x384xf32>
    %15 = arith.mulf %14, %11 : vector<8x384xf32>
    %16 = arith.subf %13, %15 : vector<8x384xf32>
    %17 = arith.addf %0, %16 : vector<8x384xf32>
    %18 = vector.broadcast %8 : vector<1x384xf32> to vector<8x384xf32>
    %19 = arith.mulf %18, %6 : vector<8x384xf32>
    %20 = vector.broadcast %3 : vector<1x384xf32> to vector<8x384xf32>
    %21 = arith.mulf %20, %11 : vector<8x384xf32>
    %22 = arith.addf %19, %21 : vector<8x384xf32>
    %23 = arith.addf %1, %22 : vector<8x384xf32>
    %c0_15 = arith.constant 0 : index
    %c0_16 = arith.constant 0 : index
    %c1_17 = arith.constant 1 : index
    %c0_18 = arith.constant 0 : index
    %24 = vector.load %arg2[%c0_15, %c0_16, %c1_17, %c0_18] : memref<2x2x8x384xf32, #tpu.memory_space<vmem>>, vector<1x1x1x384xf32>
    %25 = vector.shape_cast %24 : vector<1x1x1x384xf32> to vector<1x384xf32>
    %c0_19 = arith.constant 0 : index
    %c1_20 = arith.constant 1 : index
    %c0_21 = arith.constant 0 : index
    %c0_22 = arith.constant 0 : index
    %26 = vector.load %arg3[%c0_19, %c1_20, %c0_21, %c0_22] : memref<2x8x8x384xf32, #tpu.memory_space<vmem>>, vector<1x1x8x384xf32>
    %27 = vector.shape_cast %26 : vector<1x1x8x384xf32> to vector<1x8x384xf32>
    %28 = vector.shape_cast %27 : vector<1x8x384xf32> to vector<8x384xf32>
    %c1_23 = arith.constant 1 : index
    %c0_24 = arith.constant 0 : index
    %c1_25 = arith.constant 1 : index
    %c0_26 = arith.constant 0 : index
    %29 = vector.load %arg2[%c1_23, %c0_24, %c1_25, %c0_26] : memref<2x2x8x384xf32, #tpu.memory_space<vmem>>, vector<1x1x1x384xf32>
    %30 = vector.shape_cast %29 : vector<1x1x1x384xf32> to vector<1x384xf32>
    %c1_27 = arith.constant 1 : index
    %c1_28 = arith.constant 1 : index
    %c0_29 = arith.constant 0 : index
    %c0_30 = arith.constant 0 : index
    %31 = vector.load %arg3[%c1_27, %c1_28, %c0_29, %c0_30] : memref<2x8x8x384xf32, #tpu.memory_space<vmem>>, vector<1x1x8x384xf32>
    %32 = vector.shape_cast %31 : vector<1x1x8x384xf32> to vector<1x8x384xf32>
    %33 = vector.shape_cast %32 : vector<1x8x384xf32> to vector<8x384xf32>
    %34 = vector.broadcast %25 : vector<1x384xf32> to vector<8x384xf32>
    %35 = arith.mulf %34, %28 : vector<8x384xf32>
    %36 = vector.broadcast %30 : vector<1x384xf32> to vector<8x384xf32>
    %37 = arith.mulf %36, %33 : vector<8x384xf32>
    %38 = arith.subf %35, %37 : vector<8x384xf32>
    %39 = arith.addf %17, %38 : vector<8x384xf32>
    %40 = vector.broadcast %30 : vector<1x384xf32> to vector<8x384xf32>
    %41 = arith.mulf %40, %28 : vector<8x384xf32>
    %42 = vector.broadcast %25 : vector<1x384xf32> to vector<8x384xf32>
    %43 = arith.mulf %42, %33 : vector<8x384xf32>
    %44 = arith.addf %41, %43 : vector<8x384xf32>
    %45 = arith.addf %23, %44 : vector<8x384xf32>
    %c0_31 = arith.constant 0 : index
    %c0_32 = arith.constant 0 : index
    %c2 = arith.constant 2 : index
    %c0_33 = arith.constant 0 : index
    %46 = vector.load %arg2[%c0_31, %c0_32, %c2, %c0_33] : memref<2x2x8x384xf32, #tpu.memory_space<vmem>>, vector<1x1x1x384xf32>
    %47 = vector.shape_cast %46 : vector<1x1x1x384xf32> to vector<1x384xf32>
    %c0_34 = arith.constant 0 : index
    %c2_35 = arith.constant 2 : index
    %c0_36 = arith.constant 0 : index
    %c0_37 = arith.constant 0 : index
    %48 = vector.load %arg3[%c0_34, %c2_35, %c0_36, %c0_37] : memref<2x8x8x384xf32, #tpu.memory_space<vmem>>, vector<1x1x8x384xf32>
    %49 = vector.shape_cast %48 : vector<1x1x8x384xf32> to vector<1x8x384xf32>
    %50 = vector.shape_cast %49 : vector<1x8x384xf32> to vector<8x384xf32>
    %c1_38 = arith.constant 1 : index
    %c0_39 = arith.constant 0 : index
    %c2_40 = arith.constant 2 : index
    %c0_41 = arith.constant 0 : index
    %51 = vector.load %arg2[%c1_38, %c0_39, %c2_40, %c0_41] : memref<2x2x8x384xf32, #tpu.memory_space<vmem>>, vector<1x1x1x384xf32>
    %52 = vector.shape_cast %51 : vector<1x1x1x384xf32> to vector<1x384xf32>
    %c1_42 = arith.constant 1 : index
    %c2_43 = arith.constant 2 : index
    %c0_44 = arith.constant 0 : index
    %c0_45 = arith.constant 0 : index
    %53 = vector.load %arg3[%c1_42, %c2_43, %c0_44, %c0_45] : memref<2x8x8x384xf32, #tpu.memory_space<vmem>>, vector<1x1x8x384xf32>
    %54 = vector.shape_cast %53 : vector<1x1x8x384xf32> to vector<1x8x384xf32>
    %55 = vector.shape_cast %54 : vector<1x8x384xf32> to vector<8x384xf32>
    %56 = vector.broadcast %47 : vector<1x384xf32> to vector<8x384xf32>
    %57 = arith.mulf %56, %50 : vector<8x384xf32>
    %58 = vector.broadcast %52 : vector<1x384xf32> to vector<8x384xf32>
    %59 = arith.mulf %58, %55 : vector<8x384xf32>
    %60 = arith.subf %57, %59 : vector<8x384xf32>
    %61 = arith.addf %39, %60 : vector<8x384xf32>
    %62 = vector.broadcast %52 : vector<1x384xf32> to vector<8x384xf32>
    %63 = arith.mulf %62, %50 : vector<8x384xf32>
    %64 = vector.broadcast %47 : vector<1x384xf32> to vector<8x384xf32>
    %65 = arith.mulf %64, %55 : vector<8x384xf32>
    %66 = arith.addf %63, %65 : vector<8x384xf32>
    %67 = arith.addf %45, %66 : vector<8x384xf32>
    %c0_46 = arith.constant 0 : index
    %c0_47 = arith.constant 0 : index
    %c3 = arith.constant 3 : index
    %c0_48 = arith.constant 0 : index
    %68 = vector.load %arg2[%c0_46, %c0_47, %c3, %c0_48] : memref<2x2x8x384xf32, #tpu.memory_space<vmem>>, vector<1x1x1x384xf32>
    %69 = vector.shape_cast %68 : vector<1x1x1x384xf32> to vector<1x384xf32>
    %c0_49 = arith.constant 0 : index
    %c3_50 = arith.constant 3 : index
    %c0_51 = arith.constant 0 : index
    %c0_52 = arith.constant 0 : index
    %70 = vector.load %arg3[%c0_49, %c3_50, %c0_51, %c0_52] : memref<2x8x8x384xf32, #tpu.memory_space<vmem>>, vector<1x1x8x384xf32>
    %71 = vector.shape_cast %70 : vector<1x1x8x384xf32> to vector<1x8x384xf32>
    %72 = vector.shape_cast %71 : vector<1x8x384xf32> to vector<8x384xf32>
    %c1_53 = arith.constant 1 : index
    %c0_54 = arith.constant 0 : index
    %c3_55 = arith.constant 3 : index
    %c0_56 = arith.constant 0 : index
    %73 = vector.load %arg2[%c1_53, %c0_54, %c3_55, %c0_56] : memref<2x2x8x384xf32, #tpu.memory_space<vmem>>, vector<1x1x1x384xf32>
    %74 = vector.shape_cast %73 : vector<1x1x1x384xf32> to vector<1x384xf32>
    %c1_57 = arith.constant 1 : index
    %c3_58 = arith.constant 3 : index
    %c0_59 = arith.constant 0 : index
    %c0_60 = arith.constant 0 : index
    %75 = vector.load %arg3[%c1_57, %c3_58, %c0_59, %c0_60] : memref<2x8x8x384xf32, #tpu.memory_space<vmem>>, vector<1x1x8x384xf32>
    %76 = vector.shape_cast %75 : vector<1x1x8x384xf32> to vector<1x8x384xf32>
    %77 = vector.shape_cast %76 : vector<1x8x384xf32> to vector<8x384xf32>
    %78 = vector.broadcast %69 : vector<1x384xf32> to vector<8x384xf32>
    %79 = arith.mulf %78, %72 : vector<8x384xf32>
    %80 = vector.broadcast %74 : vector<1x384xf32> to vector<8x384xf32>
    %81 = arith.mulf %80, %77 : vector<8x384xf32>
    %82 = arith.subf %79, %81 : vector<8x384xf32>
    %83 = arith.addf %61, %82 : vector<8x384xf32>
    %84 = vector.broadcast %74 : vector<1x384xf32> to vector<8x384xf32>
    %85 = arith.mulf %84, %72 : vector<8x384xf32>
    %86 = vector.broadcast %69 : vector<1x384xf32> to vector<8x384xf32>
    %87 = arith.mulf %86, %77 : vector<8x384xf32>
    %88 = arith.addf %85, %87 : vector<8x384xf32>
    %89 = arith.addf %67, %88 : vector<8x384xf32>
    %c0_61 = arith.constant 0 : index
    %c0_62 = arith.constant 0 : index
    %c0_63 = arith.constant 0 : index
    %c0_64 = arith.constant 0 : index
    %90 = vector.load %arg4[%c0_61, %c0_62, %c0_63, %c0_64] : memref<2x2x8x384xf32, #tpu.memory_space<vmem>>, vector<1x1x8x384xf32>
    %91 = vector.shape_cast %90 : vector<1x1x8x384xf32> to vector<8x384xf32>
    %92 = vector.shape_cast %83 : vector<8x384xf32> to vector<1x1x8x384xf32>
    tpu.vector_store %arg4[%c0_61, %c0_62, %c0_63, %c0_64], %92 {strides = array<i32>} : memref<2x2x8x384xf32, #tpu.memory_space<vmem>>, vector<1x1x8x384xf32>,
    %c1_65 = arith.constant 1 : index
    %c0_66 = arith.constant 0 : index
    %c0_67 = arith.constant 0 : index
    %c0_68 = arith.constant 0 : index
    %93 = vector.load %arg4[%c1_65, %c0_66, %c0_67, %c0_68] : memref<2x2x8x384xf32, #tpu.memory_space<vmem>>, vector<1x1x8x384xf32>
    %94 = vector.shape_cast %93 : vector<1x1x8x384xf32> to vector<8x384xf32>
    %95 = vector.shape_cast %89 : vector<8x384xf32> to vector<1x1x8x384xf32>
    tpu.vector_store %arg4[%c1_65, %c0_66, %c0_67, %c0_68], %95 {strides = array<i32>} : memref<2x2x8x384xf32, #tpu.memory_space<vmem>>, vector<1x1x8x384xf32>,
    %cst_69 = arith.constant 0.000000e+00 : f32
    %96 = vector.broadcast %cst_69 : f32 to vector<8x384xf32>
    %cst_70 = arith.constant 0.000000e+00 : f32
    %97 = vector.broadcast %cst_70 : f32 to vector<8x384xf32>
    %c0_71 = arith.constant 0 : index
    %c1_72 = arith.constant 1 : index
    %c0_73 = arith.constant 0 : index
    %c0_74 = arith.constant 0 : index
    %98 = vector.load %arg2[%c0_71, %c1_72, %c0_73, %c0_74] : memref<2x2x8x384xf32, #tpu.memory_space<vmem>>, vector<1x1x1x384xf32>
    %99 = vector.shape_cast %98 : vector<1x1x1x384xf32> to vector<1x384xf32>
    %c0_75 = arith.constant 0 : index
    %c0_76 = arith.constant 0 : index
    %c0_77 = arith.constant 0 : index
    %c0_78 = arith.constant 0 : index
    %100 = vector.load %arg3[%c0_75, %c0_76, %c0_77, %c0_78] : memref<2x8x8x384xf32, #tpu.memory_space<vmem>>, vector<1x1x8x384xf32>
    %101 = vector.shape_cast %100 : vector<1x1x8x384xf32> to vector<1x8x384xf32>
    %102 = vector.shape_cast %101 : vector<1x8x384xf32> to vector<8x384xf32>
    %c1_79 = arith.constant 1 : index
    %c1_80 = arith.constant 1 : index
    %c0_81 = arith.constant 0 : index
    %c0_82 = arith.constant 0 : index
    %103 = vector.load %arg2[%c1_79, %c1_80, %c0_81, %c0_82] : memref<2x2x8x384xf32, #tpu.memory_space<vmem>>, vector<1x1x1x384xf32>
    %104 = vector.shape_cast %103 : vector<1x1x1x384xf32> to vector<1x384xf32>
    %c1_83 = arith.constant 1 : index
    %c0_84 = arith.constant 0 : index
    %c0_85 = arith.constant 0 : index
    %c0_86 = arith.constant 0 : index
    %105 = vector.load %arg3[%c1_83, %c0_84, %c0_85, %c0_86] : memref<2x8x8x384xf32, #tpu.memory_space<vmem>>, vector<1x1x8x384xf32>
    %106 = vector.shape_cast %105 : vector<1x1x8x384xf32> to vector<1x8x384xf32>
    %107 = vector.shape_cast %106 : vector<1x8x384xf32> to vector<8x384xf32>
    %108 = vector.broadcast %99 : vector<1x384xf32> to vector<8x384xf32>
    %109 = arith.mulf %108, %102 : vector<8x384xf32>
    %110 = vector.broadcast %104 : vector<1x384xf32> to vector<8x384xf32>
    %111 = arith.mulf %110, %107 : vector<8x384xf32>
    %112 = arith.subf %109, %111 : vector<8x384xf32>
    %113 = arith.addf %96, %112 : vector<8x384xf32>
    %114 = vector.broadcast %104 : vector<1x384xf32> to vector<8x384xf32>
    %115 = arith.mulf %114, %102 : vector<8x384xf32>
    %116 = vector.broadcast %99 : vector<1x384xf32> to vector<8x384xf32>
    %117 = arith.mulf %116, %107 : vector<8x384xf32>
    %118 = arith.addf %115, %117 : vector<8x384xf32>
    %119 = arith.addf %97, %118 : vector<8x384xf32>
    %c0_87 = arith.constant 0 : index
    %c1_88 = arith.constant 1 : index
    %c1_89 = arith.constant 1 : index
    %c0_90 = arith.constant 0 : index
    %120 = vector.load %arg2[%c0_87, %c1_88, %c1_89, %c0_90] : memref<2x2x8x384xf32, #tpu.memory_space<vmem>>, vector<1x1x1x384xf32>
    %121 = vector.shape_cast %120 : vector<1x1x1x384xf32> to vector<1x384xf32>
    %c0_91 = arith.constant 0 : index
    %c1_92 = arith.constant 1 : index
    %c0_93 = arith.constant 0 : index
    %c0_94 = arith.constant 0 : index
    %122 = vector.load %arg3[%c0_91, %c1_92, %c0_93, %c0_94] : memref<2x8x8x384xf32, #tpu.memory_space<vmem>>, vector<1x1x8x384xf32>
    %123 = vector.shape_cast %122 : vector<1x1x8x384xf32> to vector<1x8x384xf32>
    %124 = vector.shape_cast %123 : vector<1x8x384xf32> to vector<8x384xf32>
    %c1_95 = arith.constant 1 : index
    %c1_96 = arith.constant 1 : index
    %c1_97 = arith.constant 1 : index
    %c0_98 = arith.constant 0 : index
    %125 = vector.load %arg2[%c1_95, %c1_96, %c1_97, %c0_98] : memref<2x2x8x384xf32, #tpu.memory_space<vmem>>, vector<1x1x1x384xf32>
    %126 = vector.shape_cast %125 : vector<1x1x1x384xf32> to vector<1x384xf32>
    %c1_99 = arith.constant 1 : index
    %c1_100 = arith.constant 1 : index
    %c0_101 = arith.constant 0 : index
    %c0_102 = arith.constant 0 : index
    %127 = vector.load %arg3[%c1_99, %c1_100, %c0_101, %c0_102] : memref<2x8x8x384xf32, #tpu.memory_space<vmem>>, vector<1x1x8x384xf32>
    %128 = vector.shape_cast %127 : vector<1x1x8x384xf32> to vector<1x8x384xf32>
    %129 = vector.shape_cast %128 : vector<1x8x384xf32> to vector<8x384xf32>
    %130 = vector.broadcast %121 : vector<1x384xf32> to vector<8x384xf32>
    %131 = arith.mulf %130, %124 : vector<8x384xf32>
    %132 = vector.broadcast %126 : vector<1x384xf32> to vector<8x384xf32>
    %133 = arith.mulf %132, %129 : vector<8x384xf32>
    %134 = arith.subf %131, %133 : vector<8x384xf32>
    %135 = arith.addf %113, %134 : vector<8x384xf32>
    %136 = vector.broadcast %126 : vector<1x384xf32> to vector<8x384xf32>
    %137 = arith.mulf %136, %124 : vector<8x384xf32>
    %138 = vector.broadcast %121 : vector<1x384xf32> to vector<8x384xf32>
    %139 = arith.mulf %138, %129 : vector<8x384xf32>
    %140 = arith.addf %137, %139 : vector<8x384xf32>
    %141 = arith.addf %119, %140 : vector<8x384xf32>
    %c0_103 = arith.constant 0 : index
    %c1_104 = arith.constant 1 : index
    %c2_105 = arith.constant 2 : index
    %c0_106 = arith.constant 0 : index
    %142 = vector.load %arg2[%c0_103, %c1_104, %c2_105, %c0_106] : memref<2x2x8x384xf32, #tpu.memory_space<vmem>>, vector<1x1x1x384xf32>
    %143 = vector.shape_cast %142 : vector<1x1x1x384xf32> to vector<1x384xf32>
    %c0_107 = arith.constant 0 : index
    %c2_108 = arith.constant 2 : index
    %c0_109 = arith.constant 0 : index
    %c0_110 = arith.constant 0 : index
    %144 = vector.load %arg3[%c0_107, %c2_108, %c0_109, %c0_110] : memref<2x8x8x384xf32, #tpu.memory_space<vmem>>, vector<1x1x8x384xf32>
    %145 = vector.shape_cast %144 : vector<1x1x8x384xf32> to vector<1x8x384xf32>
    %146 = vector.shape_cast %145 : vector<1x8x384xf32> to vector<8x384xf32>
    %c1_111 = arith.constant 1 : index
    %c1_112 = arith.constant 1 : index
    %c2_113 = arith.constant 2 : index
    %c0_114 = arith.constant 0 : index
    %147 = vector.load %arg2[%c1_111, %c1_112, %c2_113, %c0_114] : memref<2x2x8x384xf32, #tpu.memory_space<vmem>>, vector<1x1x1x384xf32>
    %148 = vector.shape_cast %147 : vector<1x1x1x384xf32> to vector<1x384xf32>
    %c1_115 = arith.constant 1 : index
    %c2_116 = arith.constant 2 : index
    %c0_117 = arith.constant 0 : index
    %c0_118 = arith.constant 0 : index
    %149 = vector.load %arg3[%c1_115, %c2_116, %c0_117, %c0_118] : memref<2x8x8x384xf32, #tpu.memory_space<vmem>>, vector<1x1x8x384xf32>
    %150 = vector.shape_cast %149 : vector<1x1x8x384xf32> to vector<1x8x384xf32>
    %151 = vector.shape_cast %150 : vector<1x8x384xf32> to vector<8x384xf32>
    %152 = vector.broadcast %143 : vector<1x384xf32> to vector<8x384xf32>
    %153 = arith.mulf %152, %146 : vector<8x384xf32>
    %154 = vector.broadcast %148 : vector<1x384xf32> to vector<8x384xf32>
    %155 = arith.mulf %154, %151 : vector<8x384xf32>
    %156 = arith.subf %153, %155 : vector<8x384xf32>
    %157 = arith.addf %135, %156 : vector<8x384xf32>
    %158 = vector.broadcast %148 : vector<1x384xf32> to vector<8x384xf32>
    %159 = arith.mulf %158, %146 : vector<8x384xf32>
    %160 = vector.broadcast %143 : vector<1x384xf32> to vector<8x384xf32>
    %161 = arith.mulf %160, %151 : vector<8x384xf32>
    %162 = arith.addf %159, %161 : vector<8x384xf32>
    %163 = arith.addf %141, %162 : vector<8x384xf32>
    %c0_119 = arith.constant 0 : index
    %c1_120 = arith.constant 1 : index
    %c3_121 = arith.constant 3 : index
    %c0_122 = arith.constant 0 : index
    %164 = vector.load %arg2[%c0_119, %c1_120, %c3_121, %c0_122] : memref<2x2x8x384xf32, #tpu.memory_space<vmem>>, vector<1x1x1x384xf32>
    %165 = vector.shape_cast %164 : vector<1x1x1x384xf32> to vector<1x384xf32>
    %c0_123 = arith.constant 0 : index
    %c3_124 = arith.constant 3 : index
    %c0_125 = arith.constant 0 : index
    %c0_126 = arith.constant 0 : index
    %166 = vector.load %arg3[%c0_123, %c3_124, %c0_125, %c0_126] : memref<2x8x8x384xf32, #tpu.memory_space<vmem>>, vector<1x1x8x384xf32>
    %167 = vector.shape_cast %166 : vector<1x1x8x384xf32> to vector<1x8x384xf32>
    %168 = vector.shape_cast %167 : vector<1x8x384xf32> to vector<8x384xf32>
    %c1_127 = arith.constant 1 : index
    %c1_128 = arith.constant 1 : index
    %c3_129 = arith.constant 3 : index
    %c0_130 = arith.constant 0 : index
    %169 = vector.load %arg2[%c1_127, %c1_128, %c3_129, %c0_130] : memref<2x2x8x384xf32, #tpu.memory_space<vmem>>, vector<1x1x1x384xf32>
    %170 = vector.shape_cast %169 : vector<1x1x1x384xf32> to vector<1x384xf32>
    %c1_131 = arith.constant 1 : index
    %c3_132 = arith.constant 3 : index
    %c0_133 = arith.constant 0 : index
    %c0_134 = arith.constant 0 : index
    %171 = vector.load %arg3[%c1_131, %c3_132, %c0_133, %c0_134] : memref<2x8x8x384xf32, #tpu.memory_space<vmem>>, vector<1x1x8x384xf32>
    %172 = vector.shape_cast %171 : vector<1x1x8x384xf32> to vector<1x8x384xf32>
    %173 = vector.shape_cast %172 : vector<1x8x384xf32> to vector<8x384xf32>
    %174 = vector.broadcast %165 : vector<1x384xf32> to vector<8x384xf32>
    %175 = arith.mulf %174, %168 : vector<8x384xf32>
    %176 = vector.broadcast %170 : vector<1x384xf32> to vector<8x384xf32>
    %177 = arith.mulf %176, %173 : vector<8x384xf32>
    %178 = arith.subf %175, %177 : vector<8x384xf32>
    %179 = arith.addf %157, %178 : vector<8x384xf32>
    %180 = vector.broadcast %170 : vector<1x384xf32> to vector<8x384xf32>
    %181 = arith.mulf %180, %168 : vector<8x384xf32>
    %182 = vector.broadcast %165 : vector<1x384xf32> to vector<8x384xf32>
    %183 = arith.mulf %182, %173 : vector<8x384xf32>
    %184 = arith.addf %181, %183 : vector<8x384xf32>
    %185 = arith.addf %163, %184 : vector<8x384xf32>
    %c0_135 = arith.constant 0 : index
    %c1_136 = arith.constant 1 : index
    %c0_137 = arith.constant 0 : index
    %c0_138 = arith.constant 0 : index
    %186 = vector.load %arg4[%c0_135, %c1_136, %c0_137, %c0_138] : memref<2x2x8x384xf32, #tpu.memory_space<vmem>>, vector<1x1x8x384xf32>
    %187 = vector.shape_cast %186 : vector<1x1x8x384xf32> to vector<8x384xf32>
    %188 = vector.shape_cast %179 : vector<8x384xf32> to vector<1x1x8x384xf32>
    tpu.vector_store %arg4[%c0_135, %c1_136, %c0_137, %c0_138], %188 {strides = array<i32>} : memref<2x2x8x384xf32, #tpu.memory_space<vmem>>, vector<1x1x8x384xf32>,
    %c1_139 = arith.constant 1 : index
    %c1_140 = arith.constant 1 : index
    %c0_141 = arith.constant 0 : index
    %c0_142 = arith.constant 0 : index
    %189 = vector.load %arg4[%c1_139, %c1_140, %c0_141, %c0_142] : memref<2x2x8x384xf32, #tpu.memory_space<vmem>>, vector<1x1x8x384xf32>
    %190 = vector.shape_cast %189 : vector<1x1x8x384xf32> to vector<8x384xf32>
    %191 = vector.shape_cast %185 : vector<8x384xf32> to vector<1x1x8x384xf32>
    tpu.vector_store %arg4[%c1_139, %c1_140, %c0_141, %c0_142], %191 {strides = array<i32>} : memref<2x2x8x384xf32, #tpu.memory_space<vmem>>, vector<1x1x8x384xf32>,
    return
  }
  func.func @transform_0(%arg0: i32, %arg1: i32) -> (i32, i32, i32, i32) {
    %c0_i32 = arith.constant 0 : i32
    %c0_i32_0 = arith.constant 0 : i32
    %c0_i32_1 = arith.constant 0 : i32
    %c0_i32_2 = arith.constant 0 : i32
    return %c0_i32, %c0_i32_0, %c0_i32_1, %arg0 : i32, i32, i32, i32
  }
  func.func @transform_1(%arg0: i32, %arg1: i32) -> (i32, i32, i32, i32) {
    %c0_i32 = arith.constant 0 : i32
    %c0_i32_0 = arith.constant 0 : i32
    %c0_i32_1 = arith.constant 0 : i32
    return %c0_i32, %c0_i32_0, %arg1, %arg0 : i32, i32, i32, i32
  }
  func.func @transform_2(%arg0: i32, %arg1: i32) -> (i32, i32, i32, i32) {
    %c0_i32 = arith.constant 0 : i32
    %c0_i32_0 = arith.constant 0 : i32
    %c0_i32_1 = arith.constant 0 : i32
    return %c0_i32, %c0_i32_0, %arg1, %arg0 : i32, i32, i32, i32
  }
}

</mosaic_0001>

<bundles_post_ra>
// kernel: tpu_custom_call.1
= control target key start
LH: loop header
LB: loop body
LE: loop exit
PB: predicated region body
PF: predicated region fallthrough
CT: control target
= control target key end

     0   :  { %s1827_s0 = inlined_call_operand.hbm [shape: f32[2,2,8,768], index: 0, kind: input, shape index: {}]   ;;  %s1828_s1 = inlined_call_operand.hbm [shape: f32[2,8,8,768], index: 1, kind: input, shape index: {}]   ;;  %s1829_s2 = inlined_call_operand.hbm [shape: f32[2,2,8,768], index: 2, kind: output, shape index: {}]  }
   0x1   :  { %1840 = sst [smem:[#allocation18_spill]] %s1827_s0 }
   0x2   :  { %7 = vsyncpa [#allocation3], 0 }
   0x3   :  { %9 = vsyncpa [#allocation3 + $0x1], 0 }
   0x4   :  { %10 = vsyncpa [#allocation6], 0 }
   0x5   :  { %12 = vsyncpa [#allocation6 + $0x1], 0 }
   0x6   :  { %13 = vsyncpa [#allocation4], 0 }
   0x7   :  { %15 = vsyncpa [#allocation4 + $0x1], 0  ;;  %s1229_s9 = smov 0   ;;  %s1231_s10 = smov 0  }
   0x8   :  { %s1233_s11 = smov 0   ;;  %s1235_s12 = smov 0  }
   0x9   :  { %s1237_s13 = smov 0   ;;  %s1239_s14 = smov 0  }
   0xa LB: > { %s907_s15 = sadd.s32 4294967295, %s1203_s14   ;;  %s908_s16 = sadd.s32 4294967294, %s1203_s14   ;;  %s1203_s14 = sphi %s1239_s14, %s21_s14   ;;  %s1199_s13 = sphi %s1237_s13, %s1866_s13   ;;  %s1195_s12 = sphi %s1235_s12, %s1865_s12   ;;  %s1191_s11 = sphi %s1233_s11, %s1864_s11   ;;  %s1187_s10 = sphi %s1231_s10, %s1863_s10   ;;  %s1183_s9 = sphi %s1229_s9, %s1862_s9  }
   0xb   : > { %s33_s17 = sadd.s32 1, %s1199_s13  ;;  %s40_s18 = sadd.s32 1, %s1191_s11 }
   0xc   : > { %p35_p0 = scmp.ge.s32.totalorder %s33_s17, 2  ;;  %p47_p1 = scmp.ne.s32.totalorder %s1191_s11, %s1187_s10 }
   0xd   : > { %p48_p2 = scmp.eq.s32.totalorder %s1203_s14, 0  ;;  %p53_p3 = scmp.ne.s32.totalorder %s1187_s10, %s1183_s9 }
   0xe   : > { %s1868_s17 = smov (%p35_p0, %s33_s17), 0  ;;  %p54_p5 = scmp.eq.s32.totalorder %s907_s15, 0 }
   0xf   : > { %p1270_p4 = por %p48_p2, %p47_p1  ;;  %s37_s20 = ssub.s32 %s1199_s13, %s1868_s17 }
  0x10   : > { %p107_p6 = scmp.eq.s32.totalorder %s907_s15, 1  ;;  %p38_p7 = scmp.eq.s32.totalorder %s37_s20, 0 }
  0x11   : > { %p1276_p8 = por %p54_p5, %p53_p3  ;;  %p113_p10 = scmp.eq.s32.totalorder %s908_s16, 1 }
  0x12   : > { %p1280_p9 = por %p107_p6, %p47_p1  ;;  %p910_p12 = scmp.ge.s32.totalorder %s1203_s14, 2 }
  0x13   : > { %s1285_s23 = scalar_select %p38_p7, %s1191_s11, %s40_s18  }
  0x14   : > { %p1287_p11 = por %p113_p10, %p53_p3  ;;  %p1007_p13 = scmp.lt.s32.totalorder %s1203_s14, 2 }
  0x15   : > { %s1294_s25 = sand.u32 1, %s1191_s11   ;;  %s983_s27 = smul.u32 384, %s1199_s13 }
  0x16   : > { %s986_s26 = smul.u32 96, %s1294_s25  ;;  %p1300_p0 = pnand %p1007_p13, %p1270_p4 }
  0x17   : > { %s1846_s0 = sld [smem:[#allocation18_spill]]  ;;  %s134_s6 = scalar_lea.sflag [#allocation3], %s1294_s25 }
  0x18   : > { %s137_s4 = scalar_lea.vmem [#allocation2], %s986_s26  ;;  %p1065_p1 = pneg %p1300_p0 }
  0x19   : > { %s144_s5 = sshll.u32 %s137_s4, 4  ;;  %s1205_s8 = smov [#allocation2]   ;;  %s145_s5 = int_to_ptr.vmem [resolvable:$true] %s144_s5 }
  0x1a   : > { %s1076_s7 = scalar_lea.vmem %s145_s5, 1536  ;;  %s1081_s15 = sshll.u32 %s1205_s8, 4  ;;  %s1082_s15 = int_to_ptr.vmem [resolvable:$false] %s1081_s15 }
  0x1b   : > { %p1077_p2 = scmp.ne.s32.totalorder %s145_s5, %s1076_s7  ;;  %s1083_s16 = scalar_lea.vmem %s1082_s15, 3072 }
  0x1c   : > { %p1084_p5 = scmp.lt.s32.totalorder %s145_s5, %s1082_s15  ;;  %p1085_p6 = scmp.lt.s32.totalorder %s1083_s16, %s1076_s7 }
  0x1d   : > { %s143_s3 = scalar_lea.hbm %s1846_s0, %s983_s27  ;;  %p1079_p3 = pnand %p1077_p2, %p1065_p1 }
  0x1e   : > { %p1086_p7 = por %p1085_p6, %p1084_p5 }
  0x1f   : > { %p1080_p4 = pneg %p1079_p3 }
  0x21   : > { %p1087_p10 = pnand %p1086_p7, %p1080_p4 }
  0x23   : > { %1090 = shalt.err (!%p1087_p10)
}
  0x24   : > { %s1206_s18 = smov 768   ;;  %s1207_s19 = smov 384  }
  0x25   : > { %s1208_s20 = smov 24   ;;  %p913_p13 = scmp.ge.s32.totalorder %s1203_s14, 1 }
  0x26   : > { %999 = dma.hbm_to_vmem [thread:$0]  (!%p1300_p0), %s143_s3, 1536, %s145_s5, %s134_s6, %s1206_s18, %s1207_s19, %s1208_s20  }
  0x27   : > { %p175_p2 = scmp.lt.s32.totalorder %s1203_s14, 3  ;;  %s987_s26 = smul.u32 384, %s1294_s25 }
  0x28   : > { %s166_s7 = scalar_lea.hbm %s1828_s1, %s983_s27  ;;  %s155_s16 = scalar_lea.sflag [#allocation6], %s1294_s25 }
  0x29   : > { %p1322_p3 = pnand %p913_p13, %p175_p2  ;;  %s158_s8 = scalar_lea.vmem [#allocation5], %s987_s26 }
  0x2a   : > { %s167_s15 = sshll.u32 %s158_s8, 4  ;;  %s1209_s3 = smov [#allocation5]   ;;  %s168_s15 = int_to_ptr.vmem [resolvable:$true] %s167_s15 }
  0x2b   : > { %s1104_s0 = scalar_lea.vmem %s168_s15, 6144  ;;  %s1109_s5 = sshll.u32 %s1209_s3, 4  ;;  %s1110_s5 = int_to_ptr.vmem [resolvable:$false] %s1109_s5 }
  0x2c   : > { %p1105_p4 = scmp.ne.s32.totalorder %s168_s15, %s1104_s0  ;;  %s1111_s6 = scalar_lea.vmem %s1110_s5, 12288 }
  0x2d   : > { %p1112_p7 = scmp.lt.s32.totalorder %s168_s15, %s1110_s5  ;;  %p1113_p10 = scmp.lt.s32.totalorder %s1111_s6, %s1104_s0 }
  0x2e   : > { %p1107_p5 = pnand %p1105_p4, %p1065_p1 }
  0x2f   : > { %p1114_p13 = por %p1113_p10, %p1112_p7 }
  0x30   : > { %p1108_p6 = pneg %p1107_p5 }
  0x32   : > { %p1115_p2 = pnand %p1114_p13, %p1108_p6 }
  0x34   : > { %1118 = shalt.err (!%p1115_p2)
}
  0x35   : > { %1002 = dma.hbm_to_vmem [thread:$0]  (!%p1300_p0), %s166_s7, 6144, %s168_s15, %s155_s16, %s1206_s18, %s1207_s19, %s1208_s20  }
  0x36   : > { %179 = sbr.rel (%p1322_p3) target bundleno = 152 (0x98), region = 28 }
  0x3b   : > { %s1342_s25 = sand.u32 1, %s1187_s10  }
  0x3c   : > { %s988_s27 = smul.u32 96, %s1342_s25  ;;  %s182_s0 = scalar_lea.sflag [#allocation3], %s1342_s25 }
  0x3e   : > { %s1348_s26 = scalar_lea.vmem [#allocation2], %s988_s27 }
  0x3f   : > { %1170 = dma.done.wait (%p1276_p8), %s182_s0, 1536  }
  0x40   : > { %1172 = vsyncadd (%p1276_p8), %s182_s0, 4294965760  ;;  %s989_s28 = smul.u32 384, %s1342_s25  ;;  %s191_s18 = scalar_lea.sflag [#allocation6], %s1342_s25 }
  0x42   : > { %s1356_s19 = scalar_lea.vmem [#allocation5], %s989_s28 }
  0x43   : > { %1174 = dma.done.wait (%p1276_p8), %s191_s18, 6144  }
  0x44   : > { %1176 = vsyncadd (%p1276_p8), %s191_s18, 4294961152  ;;  %v234_v0 = vlaneseq  ;;  %v223_v5 = vld [vmem:[%s1348_s26] ss:$8 sm:$0x7]  ;;  %v1392_v14 = vld [vmem:[%s1356_s19 + $0x18] sm:$0xff]  ;;  %s1560_s21 = scalar_lea.vmem [#allocation7], %s988_s27 }
  0x45   : > { %v1370_v6 = vld [vmem:[%s1356_s19] sm:$0xff]  ;;  %v1398_v16 = vld [vmem:[%s1356_s19 + $0xd8] sm:$0xff]  ;;  %v1419_v23 = vld [vmem:[%s1356_s19 + $0x30] sm:$0xff]  ;;  %s788_s20 = sshll.u32 %s1560_s21, 4  ;;  %s985_s29 = smul.u32 384, %s1195_s12  ;;  %s1772_s20 = int_to_ptr.vmem [resolvable:$true] %s788_s20 }
  0x46   : > { %v235_v1 = vshrl.u32 %v234_v0, 7  ;;  %v1373_v7 = vld [vmem:[%s1356_s19 + $0xc0] sm:$0xff]  ;;  %v1422_v24 = vld [vmem:[%s1356_s19 + $0xf0] sm:$0xff]  ;;  %v1451_v35 = vld [vmem:[%s1356_s19 + $0x48] sm:$0xff]  ;;  %s773_s8 = scalar_lea.sflag [#allocation4], %s1342_s25  ;;  %s1119_s15 = scalar_lea.vmem %s1772_s20, 1536 }
  0x47   : > { %v914_v8 = vld [vmem:[%s1348_s26 + $0x30] ss:$8 sm:$0x7]  ;;  %v1380_v10 = vld [vmem:[%s1348_s26 + $0x1] ss:$8 sm:$0x7]  ;;  %s1778_s7 = scalar_lea.hbm %s1829_s2, %s985_s29  ;;  %p1120_p8 = scmp.ne.s32.totalorder %s1772_s20, %s1119_s15 }
  0x48   : > { %v1362_v2 = vsub.s32 0, %v235_v1  ;;  %v1364_v3 = vsub.s32 1, %v235_v1  ;;  %v1366_v4 = vsub.s32 2, %v235_v1  ;;  %v1395_v15 = vld [vmem:[%s1348_s26 + $0x31] ss:$8 sm:$0x7] }
  0x49   : > { %v926_v22 = vld [vmem:[%s1348_s26 + $0x2] ss:$8 sm:$0x7]  ;;  %v1440_v31 = vld [vmem:[%s1348_s26 + $0x3] ss:$8 sm:$0x7]  ;;  %p1121_p0 = pnand %p1120_p8, %p1280_p9 }
  0x4a   : > { %1848 = vst [vmem:[#allocation11_spill] sm:$0xff] %v1362_v2  ;;  %1849 = vst [vmem:[#allocation12_spill] sm:$0xff] %v1364_v3  ;;  %v1377_v9 = vrot.slane %v223_v5, %v1362_v2  ;;  %v1383_v11 = vrot.slane %v223_v5, %v1364_v3  ;;  %v1386_v12 = vrot.slane %v223_v5, %v1366_v4  ;;  %v930_v29 = vld [vmem:[%s1348_s26 + $0x32] ss:$8 sm:$0x7]  ;;  %v1457_v37 = vld [vmem:[%s1356_s19 + $0x108] sm:$0xff] }
  0x4b   : > { %v1389_v13 = vrot.slane %v914_v8, %v1362_v2  ;;  %v1402_v17 = vrot.slane %v1380_v10, %v1362_v2  ;;  %v1405_v18 = vrot.slane %v914_v8, %v1364_v3  ;;  %v1409_v19 = vrot.slane %v1380_v10, %v1364_v3  ;;  %v1454_v36 = vld [vmem:[%s1348_s26 + $0x33] ss:$8 sm:$0x7]  ;;  %v1473_v43 = vld [vmem:[%s1356_s19 + $0x8] sm:$0xff]  ;;  %p1122_p1 = pneg %p1121_p0  ;;  %s1210_s12 = smov [#allocation7]  }
  0x4c   : > { %v249_v20 = vmul.f32 %v1377_v9, %v1370_v6  ;;  %v1415_v21 = vrot.slane %v1395_v15, %v1362_v2  ;;  %v1426_v25 = vrot.slane %v1395_v15, %v1364_v3  ;;  %v1429_v26 = vrot.slane %v914_v8, %v1366_v4  ;;  %v1476_v44 = vld [vmem:[%s1356_s19 + $0xc8] sm:$0xff]  ;;  %v1479_v45 = vld [vmem:[%s1356_s19 + $0x20] sm:$0xff]  ;;  %v1495_v52 = vld [vmem:[%s1356_s19 + $0x38] sm:$0xff]  ;;  %s1123_s16 = sshll.u32 %s1210_s12, 4  ;;  %s1124_s16 = int_to_ptr.vmem [resolvable:$false] %s1123_s16 }
  0x4d   : > { %v268_v27 = vmul.f32 %v1373_v7, %v1389_v13  ;;  %v317_v28 = vmul.f32 %v1392_v14, %v1402_v17  ;;  %v1437_v30 = vrot.slane %v926_v22, %v1362_v2  ;;  %v1443_v32 = vrot.slane %v926_v22, %v1364_v3  ;;  %v1492_v51 = vld [vmem:[%s1356_s19 + $0xe0] sm:$0xff]  ;;  %v1498_v53 = vld [vmem:[%s1356_s19 + $0xf8] sm:$0xff]  ;;  %v1509_v58 = vld [vmem:[%s1356_s19 + $0x50] sm:$0xff]  ;;  %s1125_s3 = scalar_lea.vmem %s1124_s16, 3072  ;;  %p1126_p3 = scmp.lt.s32.totalorder %s1772_s20, %s1124_s16 }
  0x4e   : > { %v336_v33 = vmul.f32 %v1398_v16, %v1415_v21  ;;  %v1448_v34 = vrot.slane %v930_v29, %v1362_v2  ;;  %v1461_v38 = vrot.slane %v1440_v31, %v1362_v2  ;;  %v1464_v39 = vrot.slane %v930_v29, %v1364_v3  ;;  %1850 = vst [vmem:[#allocation13_spill] sm:$0xff] %v1492_v51  ;;  %v1512_v59 = vld [vmem:[%s1356_s19 + $0x10] sm:$0xff]  ;;  %p1127_p4 = scmp.lt.s32.totalorder %s1125_s3, %s1119_s15 }
  0x4f   : > { %v271_v40 = vsub.f32 %v249_v20, %v268_v27  ;;  %v385_v41 = vmul.f32 %v1419_v23, %v1437_v30  ;;  %v1470_v42 = vrot.slane %v1454_v36, %v1362_v2  ;;  %v1483_v46 = vrot.slane %v1440_v31, %v1364_v3  ;;  %1851 = vst [vmem:[#allocation14_spill] sm:$0xff] %v1498_v53  ;;  %v1519_v0 = vld [vmem:[%s1356_s19 + $0xd0] sm:$0xff] }
  0x50   : > { %v339_v47 = vsub.f32 %v317_v28, %v336_v33  ;;  %v404_v48 = vmul.f32 %v1422_v24, %v1448_v34  ;;  %v453_v49 = vmul.f32 %v1451_v35, %v1461_v38  ;;  %v250_v50 = vmul.f32 %v1383_v11, %v1473_v43  ;;  %v1522_v20 = vld [vmem:[%s1356_s19 + $0x110] sm:$0xff]  ;;  %p1128_p5 = por %p1127_p4, %p1126_p3 }
  0x51   : > { %v472_v54 = vmul.f32 %v1457_v37, %v1470_v42  ;;  %v269_v55 = vmul.f32 %v1476_v44, %v1405_v18  ;;  %v318_v56 = vmul.f32 %v1479_v45, %v1409_v19  ;;  %v337_v57 = vmul.f32 %v1492_v51, %v1426_v25 }
  0x52   : > { %v342_v60 = vadd.f32 %v339_v47, %v271_v40  ;;  %v407_v61 = vsub.f32 %v385_v41, %v404_v48  ;;  %v386_v62 = vmul.f32 %v1495_v52, %v1443_v32  ;;  %v405_v63 = vmul.f32 %v1498_v53, %v1464_v39  ;;  %v1531_v47 = vld [vmem:[%s1356_s19 + $0x28] sm:$0xff]  ;;  %p1129_p6 = pnand %p1128_p5, %p1122_p1 }
  0x53   : > { %v475_v1 = vsub.f32 %v453_v49, %v472_v54  ;;  %v272_v5 = vsub.f32 %v250_v50, %v269_v55  ;;  %v340_v8 = vsub.f32 %v318_v56, %v337_v57  ;;  %v454_v27 = vmul.f32 %v1509_v58, %v1483_v46  ;;  %v1534_v48 = vld [vmem:[%s1356_s19 + $0xe8] sm:$0xff]  ;;  %v1543_v56 = vld [vmem:[%s1356_s19 + $0x40] sm:$0xff] }
  0x54   : > { %v410_v28 = vadd.f32 %v407_v61, %v342_v60  ;;  %v408_v33 = vsub.f32 %v386_v62, %v405_v63  ;;  %v464_v40 = vrot.slane %v1454_v36, %v1364_v3  ;;  %v251_v41 = vmul.f32 %v1386_v12, %v1512_v59  ;;  %1852 = vst [vmem:[#allocation15_spill] sm:$0xff] %v1543_v56  ;;  %v1546_v57 = vld [vmem:[%s1356_s19 + $0x100] sm:$0xff] }
  0x55   : > { %v343_v49 = vadd.f32 %v340_v8, %v272_v5  ;;  %v270_v50 = vmul.f32 %v1519_v0, %v1429_v26  ;;  %v313_v54 = vrot.slane %v1380_v10, %v1366_v4  ;;  %v332_v55 = vrot.slane %v1395_v15, %v1366_v4  ;;  %1853 = vst [vmem:[#allocation16_spill] sm:$0xff] %v1546_v57  ;;  %v1556_v15 = vld [vmem:[%s1356_s19 + $0x58] sm:$0xff] }
  0x56   : > { %v478_v60 = vadd.f32 %v475_v1, %v410_v28  ;;  %v473_v61 = vmul.f32 %v1522_v20, %v464_v40  ;;  %v1550_v62 = vrot.slane %v926_v22, %v1366_v4  ;;  %v400_v63 = vrot.slane %v930_v29, %v1366_v4  ;;  %v1567_v28 = vld [vmem:[%s1356_s19 + $0x118] sm:$0xff] }
  0x57   : > { %v411_v5 = vadd.f32 %v408_v33, %v343_v49  ;;  %v273_v8 = vsub.f32 %v251_v41, %v270_v50  ;;  %v319_v10 = vmul.f32 %v1531_v47, %v313_v54  ;;  %v338_v3 = vmul.f32 %v1534_v48, %v332_v55 }
  0x58   : > { %1854 = vst [vmem:[#allocation17_spill] sm:$0xff] %v1550_v62  ;;  %493 = vst [vmem:[%s1560_s21] sm:$0xff] %v478_v60  ;;  %v476_v1 = vsub.f32 %v454_v27, %v473_v61  ;;  %v387_v22 = vmul.f32 %v1543_v56, %v1550_v62  ;;  %v406_v29 = vmul.f32 %v1546_v57, %v400_v63 }
  0x59   : > { %v449_v33 = vrot.slane %v1440_v31, %v1366_v4  ;;  %v341_v41 = vsub.f32 %v319_v10, %v338_v3  ;;  %v468_v49 = vrot.slane %v1454_v36, %v1366_v4  ;;  %v277_v50 = vmul.f32 %v1389_v13, %v1370_v6 }
  0x5a   : > { %v280_v27 = vmul.f32 %v1373_v7, %v1377_v9  ;;  %v479_v60 = vadd.f32 %v476_v1, %v411_v5  ;;  %v409_v61 = vsub.f32 %v387_v22, %v406_v29  ;;  %v345_v57 = vmul.f32 %v1392_v14, %v1415_v21 }
  0x5b   : > { %v455_v2 = vmul.f32 %v1556_v15, %v449_v33  ;;  %v344_v62 = vadd.f32 %v341_v41, %v273_v8  ;;  %v474_v31 = vmul.f32 %v1567_v28, %v468_v49  ;;  %v348_v36 = vmul.f32 %v1398_v16, %v1402_v17 }
  0x5c   : > { %v283_v3 = vadd.f32 %v280_v27, %v277_v50  ;;  %494 = vst [vmem:[%s1560_s21 + $0x8] sm:$0xff] %v479_v60  ;;  %v413_v13 = vmul.f32 %v1419_v23, %v1448_v34  ;;  %v416_v9 = vmul.f32 %v1422_v24, %v1437_v30  ;;  %v481_v5 = vmul.f32 %v1451_v35, %v1470_v42  ;;  %v1613_v27 = vld [vmem:[%s1348_s26 + $0x18] ss:$8 sm:$0x7] }
  0x5d   : > { %v484_v21 = vmul.f32 %v1457_v37, %v1461_v38  ;;  %v412_v8 = vadd.f32 %v409_v61, %v344_v62  ;;  %v477_v10 = vsub.f32 %v455_v2, %v474_v31  ;;  %v351_v1 = vadd.f32 %v348_v36, %v345_v57  ;;  %v1621_v31 = vld [vmem:[%s1348_s26 + $0x19] ss:$8 sm:$0x7] }
  0x5e   : > { %v278_v17 = vmul.f32 %v1405_v18, %v1473_v43  ;;  %v419_v22 = vadd.f32 %v416_v9, %v413_v13  ;;  %v281_v34 = vmul.f32 %v1476_v44, %v1383_v11  ;;  %v346_v30 = vmul.f32 %v1479_v45, %v1426_v25  ;;  %v1625_v13 = vld [vmem:[%s1348_s26 + $0x49] ss:$8 sm:$0x7] }
  0x5f   : > { %v487_v29 = vadd.f32 %v484_v21, %v481_v5  ;;  %v480_v42 = vadd.f32 %v477_v10, %v412_v8  ;;  %v354_v41 = vadd.f32 %v351_v1, %v283_v3  ;;  %v349_v38 = vmul.f32 %v1492_v51, %v1409_v19  ;;  %v1855_v5 = vld [vmem:[#allocation17_spill] sm:$0xff]  ;;  %v1856_v21 = vld [vmem:[#allocation16_spill] sm:$0xff]  ;;  %v1857_v1 = vld [vmem:[#allocation11_spill] sm:$0xff] }
  0x60   : > { %v414_v2 = vmul.f32 %v1495_v52, %v1464_v39  ;;  %v284_v18 = vadd.f32 %v281_v34, %v278_v17  ;;  %v417_v57 = vmul.f32 %v1498_v53, %v1443_v32  ;;  %v482_v62 = vmul.f32 %v1509_v58, %v464_v40  ;;  %v962_v34 = vld [vmem:[%s1348_s26 + $0x4a] ss:$8 sm:$0x7] }
  0x61   : > { %v485_v11 = vmul.f32 %v1522_v20, %v1483_v46  ;;  %495 = vst [vmem:[%s1560_s21 + $0x10] sm:$0xff] %v480_v42  ;;  %v422_v25 = vadd.f32 %v419_v22, %v354_v41  ;;  %v352_v50 = vadd.f32 %v349_v38, %v346_v30  ;;  %v279_v19 = vmul.f32 %v1429_v26, %v1512_v59  ;;  %v1618_v46 = vld [vmem:[%s1348_s26 + $0x48] ss:$8 sm:$0x7] }
  0x62   : > { %v282_v39 = vmul.f32 %v1519_v0, %v1386_v12  ;;  %v420_v60 = vadd.f32 %v417_v57, %v414_v2  ;;  %v347_v40 = vmul.f32 %v1531_v47, %v332_v55  ;;  %v350_v61 = vmul.f32 %v1534_v48, %v313_v54  ;;  %v966_v41 = vld [vmem:[%s1348_s26 + $0x1b] ss:$8 sm:$0x7] }
  0x63   : > { %v488_v32 = vadd.f32 %v485_v11, %v482_v62  ;;  %v490_v3 = vadd.f32 %v487_v29, %v422_v25  ;;  %v355_v26 = vadd.f32 %v352_v50, %v284_v18  ;;  %v415_v12 = vmul.f32 %v1543_v56, %v400_v63  ;;  %v958_v29 = vld [vmem:[%s1348_s26 + $0x1a] ss:$8 sm:$0x7]  ;;  %v970_v38 = vld [vmem:[%s1348_s26 + $0x4b] ss:$8 sm:$0x7] }
  0x64   : > { %v285_v36 = vadd.f32 %v282_v39, %v279_v19  ;;  %v353_v9 = vadd.f32 %v350_v61, %v347_v40  ;;  %v418_v55 = vmul.f32 %v1856_v21, %v1855_v5  ;;  %v483_v54 = vmul.f32 %v1556_v15, %v468_v49  ;;  %v1858_v40 = vld [vmem:[#allocation12_spill] sm:$0xff] }
  0x65   : > { %v486_v8 = vmul.f32 %v1567_v28, %v449_v33  ;;  %942 = vst [vmem:[%s1560_s21 + $0x30] sm:$0xff] %v490_v3  ;;  %v423_v10 = vadd.f32 %v420_v60, %v355_v26  ;;  %v1634_v17 = vrot.slane %v1613_v27, %v1857_v1  ;;  %v1638_v63 = vrot.slane %v1618_v46, %v1857_v1 }
  0x66   : > { %v1642_v22 = vrot.slane %v1621_v31, %v1857_v1  ;;  %v356_v49 = vadd.f32 %v353_v9, %v285_v36  ;;  %v421_v30 = vadd.f32 %v418_v55, %v415_v12  ;;  %v1648_v42 = vrot.slane %v1625_v13, %v1857_v1 }
  0x67   : > { %v489_v33 = vadd.f32 %v486_v8, %v483_v54  ;;  %v491_v2 = vadd.f32 %v488_v32, %v423_v10  ;;  %v526_v18 = vmul.f32 %v1634_v17, %v1370_v6  ;;  %v545_v57 = vmul.f32 %v1373_v7, %v1638_v63 }
  0x68   : > { %v592_v62 = vmul.f32 %v1392_v14, %v1642_v22  ;;  %v424_v11 = vadd.f32 %v421_v30, %v356_v49  ;;  %v611_v25 = vmul.f32 %v1398_v16, %v1648_v42  ;;  %v1661_v50 = vrot.slane %v958_v29, %v1857_v1 }
  0x69   : > { %v1664_v19 = vrot.slane %v962_v34, %v1857_v1  ;;  %943 = vst [vmem:[%s1560_s21 + $0x38] sm:$0xff] %v491_v2  ;;  %v548_v39 = vsub.f32 %v526_v18, %v545_v57  ;;  %v1668_v60 = vrot.slane %v966_v41, %v1857_v1  ;;  %v1671_v32 = vrot.slane %v970_v38, %v1857_v1 }
  0x6a   : > { %v1675_v61 = vrot.slane %v1613_v27, %v1858_v40  ;;  %v492_v3 = vadd.f32 %v489_v33, %v424_v11  ;;  %v614_v26 = vsub.f32 %v592_v62, %v611_v25  ;;  %v658_v36 = vmul.f32 %v1419_v23, %v1661_v50 }
  0x6b   : > { %v677_v12 = vmul.f32 %v1422_v24, %v1664_v19  ;;  %v724_v9 = vmul.f32 %v1451_v35, %v1668_v60  ;;  %v743_v5 = vmul.f32 %v1457_v37, %v1671_v32  ;;  %v537_v54 = vrot.slane %v1618_v46, %v1858_v40 }
  0x6c   : > { %v527_v55 = vmul.f32 %v1675_v61, %v1473_v43  ;;  %944 = vst [vmem:[%s1560_s21 + $0x40] sm:$0xff] %v492_v3  ;;  %v617_v8 = vadd.f32 %v614_v26, %v548_v39  ;;  %v1692_v1 = vrot.slane %v1621_v31, %v1858_v40  ;;  %v603_v49 = vrot.slane %v1625_v13, %v1858_v40 }
  0x6d   : > { %v680_v10 = vsub.f32 %v658_v36, %v677_v12  ;;  %v746_v30 = vsub.f32 %v724_v9, %v743_v5  ;;  %v546_v33 = vmul.f32 %v1476_v44, %v537_v54  ;;  %v1698_v2 = vrot.slane %v958_v29, %v1858_v40 }
  0x6e   : > { %v669_v18 = vrot.slane %v962_v34, %v1858_v40  ;;  %v593_v62 = vmul.f32 %v1479_v45, %v1692_v1  ;;  %v612_v11 = vmul.f32 %v1492_v51, %v603_v49  ;;  %v716_v25 = vrot.slane %v966_v41, %v1858_v40 }
  0x6f   : > { %v683_v57 = vadd.f32 %v680_v10, %v617_v8  ;;  %v549_v39 = vsub.f32 %v527_v55, %v546_v33  ;;  %v659_v3 = vmul.f32 %v1495_v52, %v1698_v2  ;;  %v735_v36 = vrot.slane %v970_v38, %v1858_v40 }
  0x70   : > { %v678_v26 = vmul.f32 %v1498_v53, %v669_v18  ;;  %v615_v9 = vsub.f32 %v593_v62, %v612_v11  ;;  %v725_v5 = vmul.f32 %v1509_v58, %v716_v25  ;;  %v522_v8 = vrot.slane %v1613_v27, %v1366_v4 }
  0x71   : > { %v749_v12 = vadd.f32 %v746_v30, %v683_v57  ;;  %v744_v51 = vmul.f32 %v1522_v20, %v735_v36  ;;  %v541_v55 = vrot.slane %v1618_v46, %v1366_v4  ;;  %v588_v33 = vrot.slane %v1621_v31, %v1366_v4 }
  0x72   : > { %v681_v10 = vsub.f32 %v659_v3, %v678_v26  ;;  %v618_v53 = vadd.f32 %v615_v9, %v549_v39  ;;  %v528_v40 = vmul.f32 %v522_v8, %v1512_v59  ;;  %v607_v30 = vrot.slane %v1625_v13, %v1366_v4 }
  0x73   : > { %974 = vst [vmem:[%s1560_s21 + $0x18] sm:$0xff] %v749_v12  ;;  %v654_v57 = vrot.slane %v958_v29, %v1366_v4  ;;  %v747_v62 = vsub.f32 %v725_v5, %v744_v51  ;;  %v547_v27 = vmul.f32 %v1519_v0, %v541_v55  ;;  %v594_v11 = vmul.f32 %v1531_v47, %v588_v33 }
  0x74   : > { %v673_v3 = vrot.slane %v962_v34, %v1366_v4  ;;  %v684_v46 = vadd.f32 %v681_v10, %v618_v53  ;;  %v613_v31 = vmul.f32 %v1534_v48, %v607_v30  ;;  %v720_v26 = vrot.slane %v966_v41, %v1366_v4 }
  0x75   : > { %v660_v39 = vmul.f32 %v1543_v56, %v654_v57  ;;  %v550_v12 = vsub.f32 %v528_v40, %v547_v27  ;;  %v739_v29 = vrot.slane %v970_v38, %v1366_v4  ;;  %v554_v51 = vmul.f32 %v1638_v63, %v1370_v6 }
  0x76   : > { %v679_v13 = vmul.f32 %v1856_v21, %v673_v3  ;;  %v750_v9 = vadd.f32 %v747_v62, %v684_v46  ;;  %v616_v5 = vsub.f32 %v594_v11, %v613_v31  ;;  %v726_v34 = vmul.f32 %v1556_v15, %v720_v26 }
  0x77   : > { %v557_v53 = vmul.f32 %v1373_v7, %v1634_v17  ;;  %v745_v56 = vmul.f32 %v1567_v28, %v739_v29  ;;  %v620_v41 = vmul.f32 %v1392_v14, %v1648_v42  ;;  %v623_v40 = vmul.f32 %v1398_v16, %v1642_v22 }
  0x78   : > { %v682_v10 = vsub.f32 %v660_v39, %v679_v13  ;;  %975 = vst [vmem:[%s1560_s21 + $0x20] sm:$0xff] %v750_v9  ;;  %v619_v4 = vadd.f32 %v616_v5, %v550_v12  ;;  %v686_v6 = vmul.f32 %v1419_v23, %v1664_v19  ;;  %v689_v63 = vmul.f32 %v1422_v24, %v1661_v50 }
  0x79   : > { %v560_v38 = vadd.f32 %v557_v53, %v554_v51  ;;  %v748_v62 = vsub.f32 %v726_v34, %v745_v56  ;;  %v626_v7 = vadd.f32 %v623_v40, %v620_v41  ;;  %v752_v17 = vmul.f32 %v1451_v35, %v1671_v32  ;;  %v1859_v56 = vld [vmem:[#allocation13_spill] sm:$0xff] }
  0x7a   : > { %v755_v14 = vmul.f32 %v1457_v37, %v1668_v60  ;;  %v685_v42 = vadd.f32 %v682_v10, %v619_v4  ;;  %v692_v16 = vadd.f32 %v689_v63, %v686_v6  ;;  %v555_v22 = vmul.f32 %v537_v54, %v1473_v43  ;;  %v1860_v37 = vld [vmem:[#allocation14_spill] sm:$0xff] }
  0x7b   : > { %v558_v27 = vmul.f32 %v1476_v44, %v1675_v61  ;;  %v629_v23 = vadd.f32 %v626_v7, %v560_v38  ;;  %v621_v24 = vmul.f32 %v1479_v45, %v603_v49  ;;  %v624_v50 = vmul.f32 %v1859_v56, %v1692_v1 }
  0x7c   : > { %v758_v19 = vadd.f32 %v755_v14, %v752_v17  ;;  %v751_v11 = vadd.f32 %v748_v62, %v685_v42  ;;  %v687_v32 = vmul.f32 %v1495_v52, %v669_v18  ;;  %v690_v60 = vmul.f32 %v1860_v37, %v1698_v2 }
  0x7d   : > { %v561_v35 = vadd.f32 %v558_v27, %v555_v22  ;;  %v695_v46 = vadd.f32 %v692_v16, %v629_v23  ;;  %v627_v31 = vadd.f32 %v624_v50, %v621_v24  ;;  %v753_v43 = vmul.f32 %v1509_v58, %v735_v36  ;;  %v1861_v58 = vld [vmem:[#allocation15_spill] sm:$0xff] }
  0x7e   : > { %v756_v44 = vmul.f32 %v1522_v20, %v716_v25  ;;  %976 = vst [vmem:[%s1560_s21 + $0x28] sm:$0xff] %v751_v11  ;;  %v693_v61 = vadd.f32 %v690_v60, %v687_v32  ;;  %v556_v45 = vmul.f32 %v541_v55, %v1512_v59  ;;  %v559_v54 = vmul.f32 %v1519_v0, %v522_v8 }
  0x7f   : > { %v622_v52 = vmul.f32 %v1531_v47, %v607_v30  ;;  %v761_v1 = vadd.f32 %v758_v19, %v695_v46  ;;  %v630_v49 = vadd.f32 %v627_v31, %v561_v35  ;;  %v625_v18 = vmul.f32 %v1534_v48, %v588_v33 }
  0x80   : > { %v759_v2 = vadd.f32 %v756_v44, %v753_v43  ;;  %v562_v39 = vadd.f32 %v559_v54, %v556_v45  ;;  %v688_v36 = vmul.f32 %v1861_v58, %v673_v3  ;;  %v691_v20 = vmul.f32 %v1856_v21, %v654_v57 }
  0x81   : > { %v754_v25 = vmul.f32 %v1556_v15, %v739_v29  ;;  %977 = vst [vmem:[%s1560_s21 + $0x48] sm:$0xff] %v761_v1  ;;  %v696_v59 = vadd.f32 %v693_v61, %v630_v49  ;;  %v628_v0 = vadd.f32 %v625_v18, %v622_v52  ;;  %v757_v47 = vmul.f32 %v1567_v28, %v720_v26 }
  0x82   : > { %v694_v8 = vadd.f32 %v691_v20, %v688_v36 }
  0x83   : > { %v762_v48 = vadd.f32 %v759_v2, %v696_v59  ;;  %v631_v55 = vadd.f32 %v628_v0, %v562_v39  ;;  %v760_v33 = vadd.f32 %v757_v47, %v754_v25 }
  0x85   : > { %978 = vst [vmem:[%s1560_s21 + $0x50] sm:$0xff] %v762_v48  ;;  %v697_v15 = vadd.f32 %v694_v8, %v631_v55 }
  0x87   : > { %v763_v28 = vadd.f32 %v760_v33, %v697_v15 }
  0x89   : > { %979 = vst [vmem:[%s1560_s21 + $0x58] sm:$0xff] %v763_v28 }
  0x8a   : > { %1132 = shalt.err (!%p1129_p6)
}
  0x8b   : > { %s1133_s5 = scalar_lea.hbm %s1778_s7, 1536  ;;  %s1137_s0 = scalar_lea.hbm %s1829_s2, 3072 }
  0x8c   : > { %p1134_p7 = scmp.ne.s32.totalorder %s1778_s7, %s1133_s5  ;;  %p1138_p2 = scmp.lt.s32.totalorder %s1778_s7, %s1829_s2 }
  0x8d   : > { %p1139_p8 = scmp.lt.s32.totalorder %s1137_s0, %s1133_s5 }
  0x8e   : > { %p1135_p10 = pnand %p1134_p7, %p1280_p9 }
  0x8f   : > { %p1140_p0 = por %p1139_p8, %p1138_p2 }
  0x90   : > { %p1136_p13 = pneg %p1135_p10 }
  0x92   : > { %p1141_p1 = pnand %p1140_p0, %p1136_p13 }
  0x94   : > { %1144 = shalt.err (!%p1141_p1)
}
  0x95   : > { %s1211_s18 = smov 384   ;;  %s1212_s19 = smov 768  }
  0x96   : > { %s1213_s21 = smov 24  }
  0x97   : > { %994 = dma.vmem_to_hbm [thread:$0]  (%p1280_p9), %s1772_s20, 1536, %s1778_s7, %s773_s8, %s1211_s18, %s1212_s19, %s1213_s21  }
  0x98 PF: > { %s803_s29 = sand.u32 1, %s1183_s9   ;;  %p1004_p3 = pnand %p910_p12, %p1287_p11 }
  0x99   : > { %s804_s30 = scalar_lea.sflag [#allocation4], %s803_s29 }
  0x9a   : > { %p1005_p4 = pneg %p1004_p3 }
  0x9c   : > { %1178 = dma.done.wait (%p1005_p4), %s804_s30, 1536  }
  0x9d   : > { %1180 = vsyncadd (%p1005_p4), %s804_s30, 4294965760  ;;  %s21_s14 = sadd.s32 1, %s1203_s14   ;;  %s1862_s9 = smov %s1187_s10 }
  0x9e   : > { %p18_p5 = scmp.ge.s32.totalorder %s21_s14, 4   ;;  %s1863_s10 = smov %s1191_s11 }
  0x9f   : > { %s1864_s11 = smov %s1285_s23  ;;  %s1865_s12 = smov %s1199_s13 }
  0xa0   : > { %s1866_s13 = smov %s1868_s17  ;;  %20 = sbr.rel (!%p18_p5) target bundleno = 10 (0xa), region = 111 }
  0xa5   :  { %809 = vsyncpa [#allocation3], 1 }
  0xa6   :  { %811 = vsyncpa [#allocation3 + $0x1], 1 }
  0xa7   :  { %812 = vsyncpa [#allocation6], 1 }
  0xa8   :  { %814 = vsyncpa [#allocation6 + $0x1], 1 }
  0xa9   :  { %815 = vsyncpa [#allocation4], 1 }
  0xaa   :  { %817 = vsyncpa [#allocation4 + $0x1], 1 }

</bundles_post_ra>
